<compile_context>
chip_gen: v7x
topology: tpu7x:2x2x1
jax: 0.10.0
libtpu: 0.0.40
codegen_flags: <defaults>
</compile_context>

<pallas_src>
import jax
import jax.numpy as jnp
from jax import lax
from jax.experimental import pallas as pl
from jax.experimental.pallas import tpu as pltpu

MU_INIT = 0.0
LOGVAR_INIT = -5.0
_NLANE = 128  # lane width of the noise slab (supports H + 2 <= 128)


def _nn_bayesian_kernel(x_ref, p_ref, n_ref, out_ref):
    """
    x_ref   : (T, D_in)            f32  — row tile of the (MC * batch) axis
    p_ref   : (2*D_in + 8, H)      f32  packed parameter slab, rows:
              [0 : D_in]        w1_mu^T      (D_in, H)
              [D_in : 2*D_in]   w1_std^T     (D_in, H)   (std precomputed host-side)
              [2*D_in]          b1_mu        (H,)
              [2*D_in + 1]      b1_std       (H,)
              [2*D_in + 2 : +4] w2_mu        (2, H)
              [2*D_in + 4 : +6] w2_std       (2, H)
              [2*D_in + 6]      b2_mu   (lanes 0:2, zero padded)
              [2*D_in + 7]      b2_std  (lanes 0:2, zero padded)
    n_ref   : (D_in + 3, T, 128)   f32  reparameterization noise:
              block i (< D_in)   : eps_w1[:, :, i]  in lanes [:H]
              block D_in         : eps_b1 in lanes [:H], eps_b2 in lanes [H:H+2]
              block D_in + 1 + o : eps_w2[:, o, :]  in lanes [:H]
    out_ref : (T, 2)  col 0 = mean, col 1 = var
    """
    T, D_in = x_ref.shape
    H = p_ref.shape[1]
    x = x_ref[...]  # (T, D_in)

    # ---- BayesianLinear 1: h = relu(sum_i x[:, i] * w1[:, i, :] + b1) -----
    b1_mu = p_ref[2 * D_in:2 * D_in + 1, :]              # (1, H)
    b1_std = p_ref[2 * D_in + 1:2 * D_in + 2, :]         # (1, H)
    h = b1_mu + b1_std * n_ref[D_in, :, :H]              # (T, H)
    for i in range(D_in):  # static unroll over D_in (= 2): pure VPU FMAs
        w1_i = (p_ref[i:i + 1, :]
                + p_ref[D_in + i:D_in + i + 1, :] * n_ref[i, :, :H])  # (T, H)
        h = h + x[:, i:i + 1] * w1_i
    h = jnp.maximum(h, 0.0)                              # ReLU

    # ---- BayesianLinear 2: out_o = sum_h w2[:, o, :] * h -------------------
    r0 = 2 * D_in + 2
    outs = []
    for o in range(2):
        w2_o = (p_ref[r0 + o:r0 + o + 1, :]
                + p_ref[r0 + 2 + o:r0 + 3 + o, :] * n_ref[D_in + 1 + o, :, :H])
        outs.append(jnp.sum(w2_o * h, axis=-1, keepdims=True))       # (T, 1)

    eb2 = n_ref[D_in, :, H:H + 2]                        # (T, 2) stolen lanes
    b2 = p_ref[r0 + 4:r0 + 5, 0:2] + p_ref[r0 + 5:r0 + 6, 0:2] * eb2

    # ---- lane-predicated epilogue: col 0 -> mean, col 1 -> clamp(exp(.)) ---
    col = lax.broadcasted_iota(jnp.int32, (T, 2), 1)
    raw = jnp.where(col == 0, outs[0], outs[1]) + b2                 # (T, 2)
    out_ref[...] = jnp.where(col == 0, raw, jnp.maximum(jnp.exp(raw), 1e-6))


def pack_params(params):
    """Pack the 8 parameter tensors into ONE (2*D_in + 8, H) f32 slab.

    std = exp(0.5 * logvar) is precomputed here (hoisted off the kernel's EUP).
    Call once per parameter set and reuse the slab across forward calls.
    """
    H, D_in = params["w1_mu"].shape

    def padded_row(v):  # (k,) -> (1, H), zero padded
        r = jnp.zeros((1, H), jnp.float32)
        return r.at[0, :v.shape[0]].set(v.astype(jnp.float32))

    return jnp.concatenate(
        [
            params["w1_mu"].T.astype(jnp.float32),                       # (D_in, H)
            jnp.exp(0.5 * params["w1_logvar"].T.astype(jnp.float32)),    # (D_in, H)
            params["b1_mu"].reshape(1, H).astype(jnp.float32),
            jnp.exp(0.5 * params["b1_logvar"].reshape(1, H).astype(jnp.float32)),
            params["w2_mu"].astype(jnp.float32),                         # (2, H)
            jnp.exp(0.5 * params["w2_logvar"].astype(jnp.float32)),      # (2, H)
            padded_row(params["b2_mu"]),
            padded_row(jnp.exp(0.5 * params["b2_logvar"].astype(jnp.float32))),
        ],
        axis=0,
    )  # (2*D_in + 8, H)


def draw_noise(key, n_rows, input_dim):
    """All reparameterization noise for one call, in the kernel's slab layout."""
    n_blocks = input_dim + 3  # D_in x eps_w1, eps_b1 (+ eps_b2 lanes), 2 x eps_w2
    return jax.random.normal(key, (n_blocks, n_rows, _NLANE), jnp.float32)


def nn_bayesian_forward(x, slab, noise, *, row_tile=64):
    """Bayesian NN forward over R = (MC samples * batch) rows in ONE call.

    Returns (mean, var), each of shape (R,).
    """
    x = jnp.asarray(x, jnp.float32)
    R, D_in = x.shape
    n_blocks, Rn, lane = noise.shape
    H = slab.shape[1]
    assert Rn == R and lane == _NLANE and n_blocks == D_in + 3
    assert H + 2 <= _NLANE, "single lane-tile kernel; H > 126 needs lane tiling"
    row_tile = min(row_tile, R)
    assert R % 8 == 0 and row_tile % 8 == 0 and R % row_tile == 0, \
        "keep row counts / tiles multiples of 8 for sublane alignment"

    grid = (R // row_tile,)
    out = pl.pallas_call(
        _nn_bayesian_kernel,
        out_shape=jax.ShapeDtypeStruct((R, 2), jnp.float32),
        grid=grid,
        in_specs=[
            pl.BlockSpec((row_tile, D_in), lambda i: (i, 0)),
            pl.BlockSpec((2 * D_in + 8, H), lambda i: (0, 0)),          # resident
            pl.BlockSpec((n_blocks, row_tile, _NLANE), lambda i: (0, i, 0)),
        ],
        out_specs=pl.BlockSpec((row_tile, 2), lambda i: (i, 0)),
        compiler_params=pltpu.CompilerParams(
            dimension_semantics=("parallel",)),       # v7x: shard rows across TCs
    )(x, slab, noise)
    return out[:, 0], out[:, 1]


def init_params(key, input_dim=2, hidden_dim=50):
    """Same init distribution as the PyTorch module, torch-native shapes."""
    ks = jax.random.split(key, 8)
    return {
        "w1_mu":     MU_INIT + 0.1 * jax.random.normal(ks[0], (hidden_dim, input_dim), jnp.float32),
        "w1_logvar": LOGVAR_INIT + 0.1 * jax.random.normal(ks[1], (hidden_dim, input_dim), jnp.float32),
        "b1_mu":     MU_INIT + 0.1 * jax.random.normal(ks[2], (hidden_dim,), jnp.float32),
        "b1_logvar": LOGVAR_INIT + 0.1 * jax.random.normal(ks[3], (hidden_dim,), jnp.float32),
        "w2_mu":     MU_INIT + 0.1 * jax.random.normal(ks[4], (2, hidden_dim), jnp.float32),
        "w2_logvar": LOGVAR_INIT + 0.1 * jax.random.normal(ks[5], (2, hidden_dim), jnp.float32),
        "b2_mu":     MU_INIT + 0.1 * jax.random.normal(ks[6], (2,), jnp.float32),
        "b2_logvar": LOGVAR_INIT + 0.1 * jax.random.normal(ks[7], (2,), jnp.float32),
    }


def reference_forward(x, params, noise):
    """Pure-JAX reference (PyTorch semantics) using the same noise slab."""
    R, D_in = x.shape
    H = params["w1_mu"].shape[0]
    ew1 = jnp.stack([noise[i, :, :H] for i in range(D_in)], axis=2)      # (R, H, D_in)
    eb1 = noise[D_in, :, :H]                                             # (R, H)
    ew2 = jnp.stack([noise[D_in + 1 + o, :, :H] for o in range(2)],
                    axis=1)                                              # (R, 2, H)
    eb2 = noise[D_in, :, H:H + 2]                                        # (R, 2)

    w1 = params["w1_mu"][None] + jnp.exp(0.5 * params["w1_logvar"])[None] * ew1
    b1 = params["b1_mu"][None] + jnp.exp(0.5 * params["b1_logvar"])[None] * eb1
    h = jax.nn.relu(jnp.einsum("bhi,bi->bh", w1, x) + b1)
    w2 = params["w2_mu"][None] + jnp.exp(0.5 * params["w2_logvar"])[None] * ew2
    b2 = params["b2_mu"][None] + jnp.exp(0.5 * params["b2_logvar"])[None] * eb2
    out = jnp.einsum("boh,bh->bo", w2, h) + b2
    mean = out[:, 0]
    var = jnp.maximum(jnp.exp(out[:, 1]), 1e-6)
    return mean, var


if __name__ == "__main__":
    input_dim, hidden_dim = 2, 50
    batch, n_mc_samples = 8, 16          # R = 128 rows serviced by ONE call

    key = jax.random.PRNGKey(0)
    k_params, k_x, k_noise = jax.random.split(key, 3)
    params = init_params(k_params, input_dim, hidden_dim)
    x_base = jax.random.normal(k_x, (batch, input_dim), jnp.float32)

    # Fold the Monte-Carlo axis into the row axis: one kernel call, R rows,
    # each row getting its own reparameterization noise (torch semantics).
    x_all = jnp.tile(x_base, (n_mc_samples, 1))                          # (R, D_in)
    R = x_all.shape[0]

    slab = pack_params(params)            # packed ONCE, reused across calls
    noise = draw_noise(k_noise, R, input_dim)

    mean, var = nn_bayesian_forward(x_all, slab, noise, row_tile=64)
    mean, var = jax.block_until_ready((mean, var))

    ref_mean, ref_var = reference_forward(x_all, params, noise)
    assert mean.shape == (R,) and var.shape == (R,)
    assert jnp.allclose(mean, ref_mean, atol=1e-5, rtol=1e-5)
    assert jnp.allclose(var, ref_var, atol=1e-5, rtol=1e-5)
    assert bool(jnp.all(var >= 1e-6))
    assert bool(jnp.all(jnp.isfinite(mean)))

    # TODO(synk): kl_loss() and posterior_robust() are host-side training /
    # analysis utilities (not part of the forward pass) and are not
    # implemented as Pallas kernels.

    print("KERNEL_OK")
</pallas_src>

<mosaic_0001>
module attributes {stable_mosaic.version = 11 : i64} {
  func.func @_nn_bayesian_kernel(%arg0: i32, %arg1: memref<64x2xf32, #tpu.memory_space<vmem>>, %arg2: memref<12x50xf32, #tpu.memory_space<vmem>>, %arg3: memref<5x64x128xf32, #tpu.memory_space<vmem>>, %arg4: memref<64x2xf32, #tpu.memory_space<vmem>>) attributes {dimension_semantics = [#tpu.dimension_semantics<parallel>], iteration_bounds = array<i64: 2>, scalar_prefetch = 0 : i64, scratch_operands = 0 : i64, tpu.core_type = #tpu.core_type<tc>, window_params = [{transform_indices = @transform_0, window_bounds = array<i64: 64, 2>}, {pipeline_mode = #tpu.pipeline_mode<synchronous>, transform_indices = @transform_1, window_bounds = array<i64: 12, 50>}, {transform_indices = @transform_2, window_bounds = array<i64: 5, 64, 128>}, {transform_indices = @transform_3, window_bounds = array<i64: 64, 2>}]} {
    %c0 = arith.constant 0 : index
    %c0_0 = arith.constant 0 : index
    %0 = vector.load %arg1[%c0, %c0_0] : memref<64x2xf32, #tpu.memory_space<vmem>>, vector<64x2xf32>
    %c4 = arith.constant 4 : index
    %c0_1 = arith.constant 0 : index
    %1 = vector.load %arg2[%c4, %c0_1] : memref<12x50xf32, #tpu.memory_space<vmem>>, vector<1x50xf32>
    %c5 = arith.constant 5 : index
    %c0_2 = arith.constant 0 : index
    %2 = vector.load %arg2[%c5, %c0_2] : memref<12x50xf32, #tpu.memory_space<vmem>>, vector<1x50xf32>
    %c2 = arith.constant 2 : index
    %c0_3 = arith.constant 0 : index
    %c0_4 = arith.constant 0 : index
    %3 = vector.load %arg3[%c2, %c0_3, %c0_4] : memref<5x64x128xf32, #tpu.memory_space<vmem>>, vector<1x64x50xf32>
    %4 = vector.shape_cast %3 : vector<1x64x50xf32> to vector<64x50xf32>
    %5 = vector.broadcast %2 : vector<1x50xf32> to vector<64x50xf32>
    %6 = arith.mulf %5, %4 : vector<64x50xf32>
    %7 = vector.broadcast %1 : vector<1x50xf32> to vector<64x50xf32>
    %8 = arith.addf %7, %6 : vector<64x50xf32>
    %c0_5 = arith.constant 0 : index
    %c0_6 = arith.constant 0 : index
    %9 = vector.load %arg2[%c0_5, %c0_6] : memref<12x50xf32, #tpu.memory_space<vmem>>, vector<1x50xf32>
    %c2_7 = arith.constant 2 : index
    %c0_8 = arith.constant 0 : index
    %10 = vector.load %arg2[%c2_7, %c0_8] : memref<12x50xf32, #tpu.memory_space<vmem>>, vector<1x50xf32>
    %c0_9 = arith.constant 0 : index
    %c0_10 = arith.constant 0 : index
    %c0_11 = arith.constant 0 : index
    %11 = vector.load %arg3[%c0_9, %c0_10, %c0_11] : memref<5x64x128xf32, #tpu.memory_space<vmem>>, vector<1x64x50xf32>
    %12 = vector.shape_cast %11 : vector<1x64x50xf32> to vector<64x50xf32>
    %13 = vector.broadcast %10 : vector<1x50xf32> to vector<64x50xf32>
    %14 = arith.mulf %13, %12 : vector<64x50xf32>
    %15 = vector.broadcast %9 : vector<1x50xf32> to vector<64x50xf32>
    %16 = arith.addf %15, %14 : vector<64x50xf32>
    %17 = vector.extract_strided_slice %0 {offsets = [0, 0], sizes = [64, 1], strides = [1, 1]} : vector<64x2xf32> to vector<64x1xf32>
    %18 = vector.broadcast %17 : vector<64x1xf32> to vector<64x50xf32>
    %19 = arith.mulf %18, %16 : vector<64x50xf32>
    %20 = arith.addf %8, %19 : vector<64x50xf32>
    %c1 = arith.constant 1 : index
    %c0_12 = arith.constant 0 : index
    %21 = vector.load %arg2[%c1, %c0_12] : memref<12x50xf32, #tpu.memory_space<vmem>>, vector<1x50xf32>
    %c3 = arith.constant 3 : index
    %c0_13 = arith.constant 0 : index
    %22 = vector.load %arg2[%c3, %c0_13] : memref<12x50xf32, #tpu.memory_space<vmem>>, vector<1x50xf32>
    %c1_14 = arith.constant 1 : index
    %c0_15 = arith.constant 0 : index
    %c0_16 = arith.constant 0 : index
    %23 = vector.load %arg3[%c1_14, %c0_15, %c0_16] : memref<5x64x128xf32, #tpu.memory_space<vmem>>, vector<1x64x50xf32>
    %24 = vector.shape_cast %23 : vector<1x64x50xf32> to vector<64x50xf32>
    %25 = vector.broadcast %22 : vector<1x50xf32> to vector<64x50xf32>
    %26 = arith.mulf %25, %24 : vector<64x50xf32>
    %27 = vector.broadcast %21 : vector<1x50xf32> to vector<64x50xf32>
    %28 = arith.addf %27, %26 : vector<64x50xf32>
    %29 = vector.extract_strided_slice %0 {offsets = [0, 1], sizes = [64, 1], strides = [1, 1]} : vector<64x2xf32> to vector<64x1xf32>
    %30 = vector.broadcast %29 : vector<64x1xf32> to vector<64x50xf32>
    %31 = arith.mulf %30, %28 : vector<64x50xf32>
    %32 = arith.addf %20, %31 : vector<64x50xf32>
    %cst = arith.constant 0.000000e+00 : f32
    %33 = vector.broadcast %cst : f32 to vector<64x50xf32>
    %34 = arith.maximumf %32, %33 : vector<64x50xf32>
    %c6 = arith.constant 6 : index
    %c0_17 = arith.constant 0 : index
    %35 = vector.load %arg2[%c6, %c0_17] : memref<12x50xf32, #tpu.memory_space<vmem>>, vector<1x50xf32>
    %c8 = arith.constant 8 : index
    %c0_18 = arith.constant 0 : index
    %36 = vector.load %arg2[%c8, %c0_18] : memref<12x50xf32, #tpu.memory_space<vmem>>, vector<1x50xf32>
    %c3_19 = arith.constant 3 : index
    %c0_20 = arith.constant 0 : index
    %c0_21 = arith.constant 0 : index
    %37 = vector.load %arg3[%c3_19, %c0_20, %c0_21] : memref<5x64x128xf32, #tpu.memory_space<vmem>>, vector<1x64x50xf32>
    %38 = vector.shape_cast %37 : vector<1x64x50xf32> to vector<64x50xf32>
    %39 = vector.broadcast %36 : vector<1x50xf32> to vector<64x50xf32>
    %40 = arith.mulf %39, %38 : vector<64x50xf32>
    %41 = vector.broadcast %35 : vector<1x50xf32> to vector<64x50xf32>
    %42 = arith.addf %41, %40 : vector<64x50xf32>
    %43 = arith.mulf %42, %34 : vector<64x50xf32>
    %cst_22 = arith.constant dense<0.000000e+00> : vector<64xf32>
    %44 = vector.multi_reduction <add>, %43, %cst_22 [1] : vector<64x50xf32> to vector<64xf32>
    %45 = vector.shape_cast %44 : vector<64xf32> to vector<64x1xf32>
    %c7 = arith.constant 7 : index
    %c0_23 = arith.constant 0 : index
    %46 = vector.load %arg2[%c7, %c0_23] : memref<12x50xf32, #tpu.memory_space<vmem>>, vector<1x50xf32>
    %c9 = arith.constant 9 : index
    %c0_24 = arith.constant 0 : index
    %47 = vector.load %arg2[%c9, %c0_24] : memref<12x50xf32, #tpu.memory_space<vmem>>, vector<1x50xf32>
    %c4_25 = arith.constant 4 : index
    %c0_26 = arith.constant 0 : index
    %c0_27 = arith.constant 0 : index
    %48 = vector.load %arg3[%c4_25, %c0_26, %c0_27] : memref<5x64x128xf32, #tpu.memory_space<vmem>>, vector<1x64x50xf32>
    %49 = vector.shape_cast %48 : vector<1x64x50xf32> to vector<64x50xf32>
    %50 = vector.broadcast %47 : vector<1x50xf32> to vector<64x50xf32>
    %51 = arith.mulf %50, %49 : vector<64x50xf32>
    %52 = vector.broadcast %46 : vector<1x50xf32> to vector<64x50xf32>
    %53 = arith.addf %52, %51 : vector<64x50xf32>
    %54 = arith.mulf %53, %34 : vector<64x50xf32>
    %cst_28 = arith.constant dense<0.000000e+00> : vector<64xf32>
    %55 = vector.multi_reduction <add>, %54, %cst_28 [1] : vector<64x50xf32> to vector<64xf32>
    %56 = vector.shape_cast %55 : vector<64xf32> to vector<64x1xf32>
    %c2_29 = arith.constant 2 : index
    %c0_30 = arith.constant 0 : index
    %c50 = arith.constant 50 : index
    %57 = vector.load %arg3[%c2_29, %c0_30, %c50] : memref<5x64x128xf32, #tpu.memory_space<vmem>>, vector<1x64x2xf32>
    %58 = vector.shape_cast %57 : vector<1x64x2xf32> to vector<64x2xf32>
    %c10 = arith.constant 10 : index
    %c0_31 = arith.constant 0 : index
    %59 = vector.load %arg2[%c10, %c0_31] : memref<12x50xf32, #tpu.memory_space<vmem>>, vector<1x2xf32>
    %c11 = arith.constant 11 : index
    %c0_32 = arith.constant 0 : index
    %60 = vector.load %arg2[%c11, %c0_32] : memref<12x50xf32, #tpu.memory_space<vmem>>, vector<1x2xf32>
    %61 = vector.broadcast %60 : vector<1x2xf32> to vector<64x2xf32>
    %62 = arith.mulf %61, %58 : vector<64x2xf32>
    %63 = vector.broadcast %59 : vector<1x2xf32> to vector<64x2xf32>
    %64 = arith.addf %63, %62 : vector<64x2xf32>
    %65 = tpu.iota {dimensions = array<i32: 1>} : vector<64x2xi32>
    %c0_i32 = arith.constant 0 : i32
    %66 = vector.broadcast %c0_i32 : i32 to vector<64x2xi32>
    %67 = arith.cmpi eq, %65, %66 : vector<64x2xi32>
    %68 = vector.shape_cast %45 : vector<64x1xf32> to vector<64x1xf32>
    %69 = vector.broadcast %68 : vector<64x1xf32> to vector<64x2xf32>
    %70 = vector.shape_cast %56 : vector<64x1xf32> to vector<64x1xf32>
    %71 = vector.broadcast %70 : vector<64x1xf32> to vector<64x2xf32>
    %72 = arith.select %67, %69, %71 : vector<64x2xi1>, vector<64x2xf32>
    %73 = arith.addf %72, %64 : vector<64x2xf32>
    %c0_i32_33 = arith.constant 0 : i32
    %74 = vector.broadcast %c0_i32_33 : i32 to vector<64x2xi32>
    %75 = arith.cmpi eq, %65, %74 : vector<64x2xi32>
    %76 = math.exp %73 : vector<64x2xf32>
    %cst_34 = arith.constant 9.99999997E-7 : f32
    %77 = vector.broadcast %cst_34 : f32 to vector<64x2xf32>
    %78 = arith.maximumf %76, %77 : vector<64x2xf32>
    %79 = arith.select %75, %73, %78 : vector<64x2xi1>, vector<64x2xf32>
    %c0_35 = arith.constant 0 : index
    %c0_36 = arith.constant 0 : index
    %80 = vector.load %arg4[%c0_35, %c0_36] : memref<64x2xf32, #tpu.memory_space<vmem>>, vector<64x2xf32>
    tpu.vector_store %arg4[%c0_35, %c0_36], %79 {strides = array<i32>} : memref<64x2xf32, #tpu.memory_space<vmem>>, vector<64x2xf32>,
    return
  }
  func.func @transform_0(%arg0: i32) -> (i32, i32) {
    %c0_i32 = arith.constant 0 : i32
    %c0_i32_0 = arith.constant 0 : i32
    return %arg0, %c0_i32 : i32, i32
  }
  func.func @transform_1(%arg0: i32) -> (i32, i32) {
    %c0_i32 = arith.constant 0 : i32
    %c0_i32_0 = arith.constant 0 : i32
    %c0_i32_1 = arith.constant 0 : i32
    return %c0_i32, %c0_i32_0 : i32, i32
  }
  func.func @transform_2(%arg0: i32) -> (i32, i32, i32) {
    %c0_i32 = arith.constant 0 : i32
    %c0_i32_0 = arith.constant 0 : i32
    %c0_i32_1 = arith.constant 0 : i32
    return %c0_i32, %arg0, %c0_i32_0 : i32, i32, i32
  }
  func.func @transform_3(%arg0: i32) -> (i32, i32) {
    %c0_i32 = arith.constant 0 : i32
    %c0_i32_0 = arith.constant 0 : i32
    return %arg0, %c0_i32 : i32, i32
  }
}

</mosaic_0001>

<bundles_post_ra>
// kernel: tpu_custom_call.1
= control target key start
LH: loop header
LB: loop body
LE: loop exit
PB: predicated region body
PF: predicated region fallthrough
CT: control target
= control target key end

     0   :  { %8 = vsyncpa [#allocation3], 0  ;;  %s1400_s0 = inlined_call_operand.vmem [shape: f32[128,2], index: 0, kind: input, shape index: {}]   ;;  %s1401_s1 = inlined_call_operand.vmem [shape: f32[12,50], index: 1, kind: input, shape index: {}]   ;;  %s1402_s2 = inlined_call_operand.hbm [shape: f32[5,128,128], index: 2, kind: input, shape index: {}]   ;;  %s1403_s3 = inlined_call_operand.vmem [shape: f32[128,2], index: 3, kind: output, shape index: {}]  }
   0x1   :  { %10 = vsyncpa [#allocation3 + $0x1], 0  ;;  %s991_s12 = smov 0   ;;  %s993_s13 = smov 0  }
   0x2   :  { %s995_s14 = smov 0   ;;  %s997_s15 = smov 0  }
   0x3 LB: > { %s796_s16 = sadd.s32 4294967295, %s961_s15   ;;  %s1011_s17 = sadd.s32 1, %s961_s15   ;;  %s961_s15 = sphi %s997_s15, %s1409_s15   ;;  %s957_s14 = sphi %s995_s14, %s1408_s14   ;;  %s953_s13 = sphi %s993_s13, %s1407_s13   ;;  %s949_s12 = sphi %s991_s12, %s1406_s12  }
   0x4   : > { %s67_s18 = ssub.s32 %s961_s15, %s1011_s17  ;;  %s70_s19 = sadd.s32 1, %s957_s14 }
   0x5   : > { %p68_p0 = scmp.eq.s32.totalorder %s67_s18, 0  ;;  %p77_p1 = scmp.ne.s32.totalorder %s957_s14, %s953_s13 }
   0x6   : > { %p78_p2 = scmp.eq.s32.totalorder %s961_s15, 0  ;;  %p83_p3 = scmp.ne.s32.totalorder %s953_s13, %s949_s12 }
   0x7   : > { %s1021_s20 = scalar_select %p68_p0, %s957_s14, %s70_s19  }
   0x8   : > { %p1023_p4 = por %p78_p2, %p77_p1  ;;  %p84_p5 = scmp.eq.s32.totalorder %s796_s16, 0 }
   0x9   : > { %p799_p7 = scmp.ge.s32.totalorder %s961_s15, 2 }
   0xa   : > { %p1029_p6 = por %p84_p5, %p83_p3 }
   0xb   : > { %132 = sbr.rel (%p799_p7) target bundleno = 32 (0x20), region = 20 }
  0x12   : > { %s145_s23 = sand.u32 1, %s957_s14   ;;  %s855_s25 = sshll.u32 %s961_s15, 10 }
  0x13   : > { %s856_s24 = smul.u32 320, %s145_s23  ;;  %s963_s26 = smov 2048  }
  0x14   : > { %859 = sst [smem:[#allocation5]] (%p1023_p4), %s963_s26  ;;  %s964_s4 = smov 1024  }
  0x15   : > { %s858_s27 = scalar_select %p1023_p4, [#allocation0], [#allocation6] }
  0x16   : > { %s149_s29 = scalar_lea.vmem [#allocation2], %s856_s24  ;;  %860 = sst [smem:[#allocation5 + $0x1]] (%p1023_p4), %s964_s4 }
  0x17   : > { %s160_s28 = sld [smem:[%s858_s27]]   ;;  %s168_s30 = sshll.u32 %s149_s29, 4  ;;  %s169_s30 = int_to_ptr.vmem [resolvable:$true] %s168_s30 }
  0x18   : > { %s965_s5 = smov 8   ;;  %s155_s8 = scalar_lea.hbm %s1402_s2, %s855_s25 }
  0x19   : > { %861 = sst [smem:[#allocation5 + $0x2]] (%p1023_p4), %s965_s5  ;;  %s966_s9 = smov 128  }
  0x1a   : > { %862 = sst [smem:[#allocation5 + $0x3]] (%p1023_p4), %s966_s9  ;;  %s146_s12 = scalar_lea.sflag [#allocation3], %s145_s23 }
  0x1b   : > { %863 = sst [smem:[#allocation5 + $0x4]] (%p1023_p4), %s966_s9  ;;  %s967_s18 = smov [#allocation4]  }
  0x1c   : > { %864 = sst [smem:[#allocation5 + $0x5]] (%p1023_p4), %s965_s5 }
  0x1d   : > { %s802_s10 = sshll.u32 %s160_s28, 26 }
  0x1e   : > { %s803_s11 = sadd.s32 134217728, %s802_s10 }
  0x1f   : > { %865 = dma.general (%p1023_p4), %s155_s8, 5120, %s169_s30, %s146_s12, %s967_s18, [#allocation5], %s803_s11, 0  }
  0x20 PF: > { %p804_p8 = scmp.ge.s32.totalorder %s961_s15, 1  ;;  %p189_p9 = scmp.lt.s32.totalorder %s961_s15, 3 }
  0x22   : > { %p190_p10 = pnand %p804_p8, %p189_p9 }
  0x23   : > { %s195_s19 = sand.u32 (!%p190_p10), 1, %s953_s13  }
  0x24   : > { %193 = sbr.rel (%p190_p10) target bundleno = 404 (0x194), region = 32  ;;  %s196_s25 = scalar_lea.sflag (!%p190_p10), [#allocation3], %s195_s19 }
  0x25   : > { %s857_s24 = smul.u32 (!%p190_p10), 320, %s195_s19 }
  0x27   : > { %s1058_s26 = scalar_lea.vmem (!%p190_p10), [#allocation2], %s857_s24 }
  0x2b   : > { %944 = dma.done.wait (%p1029_p6), %s196_s25, 5120  }
  0x2c   : > { %946 = vsyncadd (%p1029_p6), %s196_s25, 4294962176  ;;  %s805_s21 = sshll.u32 %s796_s16, 3  ;;  %v968_v0 = vmov 0   ;;  %v969_v9 = vmov 1   ;;  %v810_v10 = vld [vmem:[%s1058_s26 + $0x88] sm:$0xff]  ;;  %v809_v11 = vld [vmem:[%s1058_s26 + $0x80] sm:$0xff] }
  0x2d   : > { %908 = vset.pattern.permute.xlu1 %v968_v0  ;;  %907 = vset.pattern.permute.xlu0 %v968_v0  ;;  %p228_p11 = scmp.lt.s32.totalorder %s805_s21, 15  ;;  %s970_s15 = smov 78   ;;  %v811_v12 = vld [vmem:[%s1058_s26 + $0x90] sm:$0xff]  ;;  %v812_v13 = vld [vmem:[%s1058_s26 + $0x98] sm:$0xff]  ;;  %v813_v14 = vld [vmem:[%s1058_s26 + $0xa0] sm:$0xff]  ;;  %vm507_vm0 = vcmask 408576  }
  0x2e   : > { %v814_v15 = vld [vmem:[%s1058_s26 + $0xa8] sm:$0xff]  ;;  %v817_v16 = vld [vmem:[%s1401_s1 + $0x5] ss:$0 sm:$0xff]  ;;  %v819_v19 = vld [vmem:[%s1401_s1 + $0x2] ss:$0 sm:$0xff]  ;;  %vm708_vm2 = vcmask 15360  }
  0x2f   : > { %s1411_s21 = smov (!%p228_p11, %s805_s21), 15  ;;  %v287_v20 = vld [vmem:[%s1058_s26 + $0x10] sm:$0xff]  ;;  %v265_v21 = vmul.f32 %v817_v16, %v811_v12  ;;  %v285_v22 = vld [vmem:[%s1058_s26] sm:$0xff]  ;;  %v288_v23 = vld [vmem:[%s1058_s26 + $0x18] sm:$0xff]  ;;  %v264_v24 = vmul.f32 %v817_v16, %v810_v10  ;;  %v263_v25 = vmul.f32 %v817_v16, %v809_v11  ;;  %v266_v26 = vmul.f32 %v817_v16, %v812_v13 }
  0x30   : > { %s806_s23 = sshll.u32 %s1411_s21, 3  ;;  %v268_v27 = vmul.f32 %v817_v16, %v814_v15  ;;  %v818_v28 = vld [vmem:[%s1401_s1 + $0x4] ss:$0 sm:$0xff]  ;;  %v286_v29 = vld [vmem:[%s1058_s26 + $0x8] sm:$0xff]  ;;  %v820_v31 = vld [vmem:[%s1401_s1] ss:$0 sm:$0xff]  ;;  %v299_v32 = vmul.f32 %v819_v19, %v287_v20  ;;  %v297_v35 = vmul.f32 %v819_v19, %v285_v22  ;;  %v300_v36 = vmul.f32 %v819_v19, %v288_v23 }
  0x31   : > { %s231_s29 = scalar_lea.vmem %s1400_s0, %s806_s23  ;;  %v290_v30 = vld [vmem:[%s1058_s26 + $0x28] sm:$0xff]  ;;  %v289_v37 = vld [vmem:[%s1058_s26 + $0x20] sm:$0xff]  ;;  %v1111_v38 = vld [vmem:[%s1058_s26 + $0xb8] sm:$0xff]  ;;  %v267_v40 = vmul.f32 %v817_v16, %v813_v14  ;;  %v1114_v41 = vadd.f32 %v818_v28, %v265_v21  ;;  %v298_v42 = vmul.f32 %v819_v19, %v286_v29  ;;  %v1125_v47 = vadd.f32 %v818_v28, %v263_v25  ;;  %s1347_s6 = scalar_lea.vmem %s1403_s3, %s806_s23 }
  0x32   : > { %v242_v1 = vld [vmem:[%s231_s29 + $0x10] sm:$0xff]  ;;  %v240_v2 = vld [vmem:[%s231_s29] sm:$0xff]  ;;  %v243_v3 = vld [vmem:[%s231_s29 + $0x18] sm:$0xff]  ;;  %v302_v43 = vmul.f32 %v819_v19, %v290_v30  ;;  %v1127_v48 = vadd.f32 %v818_v28, %v266_v26  ;;  %v1129_v49 = vadd.f32 %v818_v28, %v264_v24  ;;  %v1131_v50 = vadd.f32 %v818_v28, %v268_v27 }
  0x33   : > { %329 = vperm.xlu1 %908, %v242_v1   ;;  %319 = vperm.xlu0 %907, %v240_v2   ;;  %v241_v4 = vld [vmem:[%s231_s29 + $0x8] sm:$0xff]  ;;  %v244_v6 = vld [vmem:[%s231_s29 + $0x20] sm:$0xff]  ;;  %v247_v7 = vld [vmem:[%s231_s29 + $0x38] sm:$0xff]  ;;  %v311_v54 = vadd.f32 %v820_v31, %v299_v32  ;;  %v301_v56 = vmul.f32 %v819_v19, %v289_v37  ;;  %v270_v58 = vmul.f32 %v817_v16, %v1111_v38 }
  0x34   : > { %v245_v5 = vld [vmem:[%s231_s29 + $0x28] sm:$0xff]  ;;  %v246_v8 = vld [vmem:[%s231_s29 + $0x30] sm:$0xff]  ;;  %v292_v39 = vld [vmem:[%s1058_s26 + $0x38] sm:$0xff]  ;;  %v309_v63 = vadd.f32 %v820_v31, %v297_v35  ;;  %v312_v0 = vadd.f32 %v820_v31, %v300_v36 }
  0x35   : > { %v1117_v44 = vld [vmem:[%s1058_s26 + $0xb0] sm:$0xff]  ;;  %v1123_v46 = vld [vmem:[%s1401_s1 + $0x3] ss:$0 sm:$0xff]  ;;  %v822_v51 = vld [vmem:[%s1058_s26 + $0x48] sm:$0xff]  ;;  %v304_v59 = vmul.f32 %v819_v19, %v292_v39 }
  0x36   : > { %v291_v45 = vld [vmem:[%s1058_s26 + $0x30] sm:$0xff]  ;;  %v821_v52 = vld [vmem:[%s1058_s26 + $0x40] sm:$0xff]  ;;  %v824_v60 = vld [vmem:[%s1058_s26 + $0x58] sm:$0xff] }
  0x37   : > { %334 = vperm.xlu1 %908, %v243_v3   ;;  %324 = vperm.xlu0 %907, %v241_v4   ;;  %v823_v53 = vld [vmem:[%s1058_s26 + $0x50] sm:$0xff]  ;;  %v1145_v61 = vld [vmem:[%s1401_s1 + $0x8] ss:$0 sm:$0xff]  ;;  %v1175_v22 = vld [vmem:[%s1401_s1 + $0x6] ss:$0 sm:$0xff] }
  0x38   : > { %v832_v62 = vld [vmem:[%s1058_s26 + $0xc8] sm:$0xff]  ;;  %v841_v25 = vld [vmem:[%s1058_s26 + $0x100] sm:$0xff]  ;;  %v833_v32 = vld [vmem:[%s1058_s26 + $0xd0] sm:$0xff] }
  0x39   : > { %v1181_v24 = vld [vmem:[%s1401_s1 + $0x9] ss:$0 sm:$0xff]  ;;  %v834_v35 = vld [vmem:[%s1058_s26 + $0xd8] sm:$0xff] }
  0x3a   : > { %v842_v36 = vld [vmem:[%s1058_s26 + $0x108] sm:$0xff] }
  0x3b   : > { %344 = vperm.xlu1 %908, %v245_v5   ;;  %339 = vperm.xlu0 %907, %v244_v6  }
  0x3f   : > { %354 = vperm.xlu1 %908, %v247_v7   ;;  %349 = vperm.xlu0 %907, %v246_v8  }
  0x43   : > { %910 = vset.pattern.permute.xlu1 %v969_v9  ;;  %909 = vset.pattern.permute.xlu0 %v969_v9  ;;  %v826_v9 = vld [vmem:[%s1058_s26 + $0x68] sm:$0xff] }
  0x44   : > { %413 = vperm.xlu1 %910, %v241_v4   ;;  %409 = vperm.xlu0 %909, %v240_v2   ;;  %v303_v2 = vmul.f32 %v819_v19, %v291_v45  ;;  %v310_v4 = vadd.f32 %v820_v31, %v298_v42  ;;  %v1166_v19 = vadd.f32 %v820_v31, %v304_v59 }
  0x45   : > { %v393_v30 = vmul.f32 %v1123_v46, %v826_v9  ;;  %v1200_v45 = vmul.f32 %v1181_v24, %v841_v25 }
  0x46   : > { %v1186_v27 = vadd.f32 %v820_v31, %v303_v2 }
  0x48   : > { %417 = vperm.xlu1 %910, %v242_v1   ;;  %421 = vperm.xlu0 %909, %v243_v3   ;;  %v269_v1 = vmul.f32 %v817_v16, %v1117_v44  ;;  %v831_v3 = vld [vmem:[%s1058_s26 + $0xc0] sm:$0xff]  ;;  %v1164_v16 = vadd.f32 %v818_v28, %v270_v58  ;;  %v1209_v58 = vmul.f32 %v1181_v24, %v842_v36 }
  0x49   : > { %v479_v23 = vmul.f32 %v1145_v61, %v831_v3 }
  0x4a   : > { %v1184_v26 = vadd.f32 %v818_v28, %v269_v1 }
  0x4c   : > { %425 = vperm.xlu1 %910, %v244_v6   ;;  %429 = vperm.xlu0 %909, %v245_v5   ;;  %v314_v5 = vadd.f32 %v820_v31, %v302_v43  ;;  %v389_v6 = vmul.f32 %v1123_v46, %v822_v51  ;;  %v491_v51 = vadd.f32 %v1175_v22, %v479_v23 }
  0x50   : > { %433 = vperm.xlu1 %910, %v246_v8   ;;  %437 = vperm.xlu0 %909, %v247_v7   ;;  %v388_v7 = vmul.f32 %v1123_v46, %v821_v52  ;;  %v825_v8 = vld [vmem:[%s1058_s26 + $0x60] sm:$0xff]  ;;  %v827_v52 = vld [vmem:[%s1058_s26 + $0x70] sm:$0xff] }
  0x51   : > { %v392_v29 = vmul.f32 %v1123_v46, %v825_v8  ;;  %v394_v8 = vmul.f32 %v1123_v46, %v827_v52 }
  0x54   : > { %615 = vrot.lane.b32.xlu1 %v810_v10, %s970_s15  ;;  %613 = vrot.lane.b32.xlu0 %v809_v11, %s970_s15  ;;  %v1154_v10 = vadd.f32 %v818_v28, %v267_v40  ;;  %v1159_v11 = vld [vmem:[%s1401_s1 + $0x1] ss:$0 sm:$0xff] }
  0x55   : > { %v401_v40 = vadd.f32 %v1159_v11, %v389_v6  ;;  %v400_v28 = vadd.f32 %v1159_v11, %v388_v7  ;;  %v404_v1 = vadd.f32 %v1159_v11, %v392_v29  ;;  %v405_v2 = vadd.f32 %v1159_v11, %v393_v30 }
  0x56   : > { %v406_v36 = vadd.f32 %v1159_v11, %v394_v8 }
  0x58   : > { %617 = vrot.lane.b32.xlu1 %v811_v12, %s970_s15  ;;  %619 = vrot.lane.b32.xlu0 %v812_v13, %s970_s15  ;;  %v390_v12 = vmul.f32 %v1123_v46, %v823_v53  ;;  %v391_v13 = vmul.f32 %v1123_v46, %v824_v60  ;;  %v828_v53 = vld [vmem:[%s1058_s26 + $0x78] sm:$0xff] }
  0x5a   : > { %v402_v42 = vadd.f32 %v1159_v11, %v390_v12 }
  0x5c   : > { %621 = vrot.lane.b32.xlu1 %v813_v14, %s970_s15  ;;  %623 = vrot.lane.b32.xlu0 %v814_v15, %s970_s15  ;;  %v480_v14 = vmul.f32 %v1145_v61, %v832_v62  ;;  %v313_v15 = vadd.f32 %v820_v31, %v301_v56  ;;  %v403_v31 = vadd.f32 %v1159_v11, %v391_v13  ;;  %v835_v56 = vld [vmem:[%s1058_s26 + $0xe0] sm:$0xff] }
  0x5e   : > { %v492_v43 = vadd.f32 %v1175_v22, %v480_v14 }
  0xb2   : > { %v1089_v17 = vpop.permute.xlu1 %329  ;;  %v1091_v18 = vpop.permute.xlu0 %319 }
  0xb3   : > { %v357_v37 = vmul.f32 %v1091_v18, %v309_v63  ;;  %v481_v18 = vmul.f32 %v1145_v61, %v833_v32  ;;  %v359_v59 = vmul.f32 %v1089_v17, %v311_v54  ;;  %v395_v17 = vmul.f32 %v1123_v46, %v828_v53 }
  0xb5   : > { %v365_v3 = vadd.f32 %v357_v37, %v1125_v47  ;;  %v493_v9 = vadd.f32 %v1175_v22, %v481_v18  ;;  %v836_v47 = vld [vmem:[%s1058_s26 + $0xe8] sm:$0xff] }
  0xb6   : > { %v1107_v33 = vpop.permute.xlu1 %334  ;;  %v325_v34 = vpop.permute.xlu0 %324 }
  0xb7   : > { %v358_v39 = vmul.f32 %v325_v34, %v310_v4  ;;  %v482_v34 = vmul.f32 %v1145_v61, %v834_v35  ;;  %v360_v60 = vmul.f32 %v1107_v33, %v312_v0  ;;  %v483_v33 = vmul.f32 %v1145_v61, %v835_v56 }
  0xb9   : > { %v366_v4 = vadd.f32 %v358_v39, %v1129_v49  ;;  %v494_v12 = vadd.f32 %v1175_v22, %v482_v34  ;;  %v367_v49 = vadd.f32 %v359_v59, %v1114_v41  ;;  %v368_v13 = vadd.f32 %v360_v60, %v1127_v48  ;;  %v837_v39 = vld [vmem:[%s1058_s26 + $0xf0] sm:$0xff] }
  0xba   : > { %v1136_v55 = vpop.permute.xlu1 %344  ;;  %v1138_v57 = vpop.permute.xlu0 %339  ;;  %v407_v41 = vadd.f32 %v1159_v11, %v395_v17  ;;  %v495_v48 = vadd.f32 %v1175_v22, %v483_v33  ;;  %v850_v17 = vld [vmem:[%s1401_s1 + $0x7] ss:$0 sm:$0xff] }
  0xbb   : > { %v362_v14 = vmul.f32 %v1136_v55, %v314_v5  ;;  %v361_v46 = vmul.f32 %v1138_v57, %v313_v15  ;;  %v484_v55 = vmul.f32 %v1145_v61, %v836_v47  ;;  %v843_v47 = vld [vmem:[%s1058_s26 + $0x110] sm:$0xff] }
  0xbd   : > { %v369_v11 = vadd.f32 %v361_v46, %v1154_v10  ;;  %v485_v10 = vmul.f32 %v1145_v61, %v837_v39 }
  0xbe   : > { %v1168_v20 = vpop.permute.xlu1 %354  ;;  %v1170_v21 = vpop.permute.xlu0 %349 }
  0xc3   : > { %v414_v62 = vpop.permute.xlu1 %413  ;;  %v410_v63 = vpop.permute.xlu0 %409 }
  0xc4   : > { %v441_v6 = vmul.f32 %v414_v62, %v401_v40  ;;  %v440_v7 = vmul.f32 %v410_v63, %v400_v28  ;;  %v838_v40 = vld [vmem:[%s1058_s26 + $0xf8] sm:$0xff]  ;;  %v370_v28 = vadd.f32 %v362_v14, %v1131_v50 }
  0xc5   : > { %v486_v59 = vmul.f32 %v1145_v61, %v838_v40  ;;  %v496_v61 = vadd.f32 %v1175_v22, %v484_v55 }
  0xc6   : > { %v1220_v54 = vadd.f32 %v441_v6, %v366_v4  ;;  %v1222_v0 = vadd.f32 %v440_v7, %v365_v3 }
  0xc7   : > { %v418_v23 = vpop.permute.xlu1 %417  ;;  %v422_v25 = vpop.permute.xlu0 %421  ;;  %v498_v8 = vadd.f32 %v1175_v22, %v486_v59 }
  0xc8   : > { %v457_v29 = vmax.f32 %v1220_v54, 0.0  ;;  %v456_v30 = vmax.f32 %v1222_v0, 0.0  ;;  %v442_v32 = vmul.f32 %v418_v23, %v402_v42  ;;  %v443_v35 = vmul.f32 %v422_v25, %v403_v31 }
  0xc9   : > { %v364_v42 = vmul.f32 %v1168_v20, %v1166_v19  ;;  %v363_v31 = vmul.f32 %v1170_v21, %v1186_v27 }
  0xca   : > { %v1237_v5 = vadd.f32 %v442_v32, %v367_v49  ;;  %v1239_v57 = vadd.f32 %v443_v35, %v368_v13  ;;  %v500_v15 = vmul.f32 %v492_v43, %v457_v29  ;;  %v499_v37 = vmul.f32 %v491_v51, %v456_v30  ;;  %v844_v49 = vld [vmem:[%s1058_s26 + $0x118] sm:$0xff] }
  0xcb   : > { %v426_v52 = vpop.permute.xlu1 %425  ;;  %v430_v53 = vpop.permute.xlu0 %429  ;;  %v372_v27 = vadd.f32 %v364_v42, %v1164_v16  ;;  %v371_v60 = vadd.f32 %v363_v31, %v1184_v26  ;;  %v497_v26 = vadd.f32 %v1175_v22, %v485_v10  ;;  %v559_v22 = vadd.f32 %v850_v17, %v1200_v45  ;;  %v847_v31 = vld [vmem:[%s1058_s26 + $0x130] sm:$0xff] }
  0xcc   : > { %v458_v18 = vmax.f32 %v1237_v5, 0.0  ;;  %v459_v43 = vmax.f32 %v1239_v57, 0.0  ;;  %v444_v34 = vmul.f32 %v426_v52, %v404_v1  ;;  %v445_v51 = vmul.f32 %v430_v53, %v405_v2  ;;  %v848_v52 = vld [vmem:[%s1058_s26 + $0x138] sm:$0xff] }
  0xcd   : > { %v511_v56 = vsel %vm507_vm0, %v500_v15, 0.0  ;;  %v508_v50 = vsel %vm507_vm0, %v499_v37, 0.0  ;;  %v560_v32 = vadd.f32 %v850_v17, %v1209_v58  ;;  %v549_v35 = vmul.f32 %v1181_v24, %v843_v47  ;;  %v852_v47 = vld [vmem:[%s1401_s1 + $0xa] ss:$0 sm:$0xff] }
  0xce   : > { %v1259_v19 = vadd.f32 %v444_v34, %v369_v11  ;;  %v1261_v20 = vadd.f32 %v445_v51, %v370_v28  ;;  %512 = vadd.xlane.f32.xlu0 %v511_v56  ;;  %509 = vadd.xlane.f32.xlu1 %v508_v50  ;;  %v501_v21 = vmul.f32 %v493_v9, %v458_v18 }
  0xcf   : > { %v434_v62 = vpop.permute.xlu1 %433  ;;  %v438_v63 = vpop.permute.xlu0 %437  ;;  %v502_v1 = vmul.f32 %v494_v12, %v459_v43  ;;  %v567_v40 = vmul.f32 %v559_v22, %v456_v30  ;;  %v568_v28 = vmul.f32 %v560_v32, %v457_v29  ;;  %v561_v11 = vadd.f32 %v850_v17, %v549_v35 }
  0xd0   : > { %v460_v2 = vmax.f32 %v1259_v19, 0.0  ;;  %v461_v3 = vmax.f32 %v1261_v20, 0.0  ;;  %v446_v4 = vmul.f32 %v434_v62, %v406_v36  ;;  %v447_v6 = vmul.f32 %v438_v63, %v407_v41  ;;  %v845_v41 = vld [vmem:[%s1058_s26 + $0x120] sm:$0xff] }
  0xd1   : > { %v514_v7 = vsel %vm507_vm0, %v501_v21, 0.0  ;;  %v517_v16 = vsel %vm507_vm0, %v502_v1, 0.0  ;;  %v550_v36 = vmul.f32 %v1181_v24, %v844_v49  ;;  %v551_v39 = vmul.f32 %v1181_v24, %v845_v41 }
  0xd2   : > { %v454_v33 = vadd.f32 %v446_v4, %v371_v60  ;;  %v455_v9 = vadd.f32 %v447_v6, %v372_v27  ;;  %515 = vadd.xlane.f32.xlu0 %v514_v7  ;;  %518 = vadd.xlane.f32.xlu1 %v517_v16  ;;  %v503_v12 = vmul.f32 %v495_v48, %v460_v2  ;;  %v846_v48 = vld [vmem:[%s1058_s26 + $0x128] sm:$0xff]  ;;  %v575_v50 = vsel %vm507_vm0, %v567_v40, 0.0 }
  0xd3   : > { %v504_v13 = vmul.f32 %v496_v61, %v461_v3  ;;  %v552_v58 = vmul.f32 %v1181_v24, %v846_v48  ;;  %v562_v42 = vadd.f32 %v850_v17, %v550_v36  ;;  %v563_v53 = vadd.f32 %v850_v17, %v551_v39  ;;  %v616_v60 = vpop.permute.xlu1 %615  ;;  %v614_v62 = vpop.permute.xlu0 %613 }
  0xd4   : > { %v462_v14 = vmax.f32 %v454_v33, 0.0  ;;  %v463_v46 = vmax.f32 %v455_v9, 0.0  ;;  %v520_v23 = vsel %vm507_vm0, %v503_v12, 0.0  ;;  %v553_v51 = vmul.f32 %v1181_v24, %v847_v31 }
  0xd5   : > { %v523_v25 = vsel %vm507_vm0, %v504_v13, 0.0  ;;  %v564_v34 = vadd.f32 %v850_v17, %v552_v58  ;;  %v554_v56 = vmul.f32 %v1181_v24, %v848_v52  ;;  %v578_v0 = vsel %vm507_vm0, %v568_v28, 0.0 }
  0xd6   : > { %521 = vadd.xlane.f32.xlu0 %v520_v23  ;;  %524 = vadd.xlane.f32.xlu1 %v523_v25  ;;  %v505_v55 = vmul.f32 %v497_v26, %v462_v14  ;;  %v506_v15 = vmul.f32 %v498_v8, %v463_v46  ;;  %v569_v54 = vmul.f32 %v561_v11, %v458_v18  ;;  %v657_v16 = vlaneseq }
  0xd7   : > { %v570_v29 = vmul.f32 %v562_v42, %v459_v43  ;;  %v565_v30 = vadd.f32 %v850_v17, %v553_v51  ;;  %v566_v10 = vadd.f32 %v850_v17, %v554_v56  ;;  %v571_v20 = vmul.f32 %v563_v53, %v460_v2  ;;  %v618_v63 = vpop.permute.xlu1 %617  ;;  %v620_v1 = vpop.permute.xlu0 %619 }
  0xd8   : > { %v526_v37 = vsel %vm507_vm0, %v505_v55, 0.0  ;;  %v529_v45 = vsel %vm507_vm0, %v506_v15, 0.0  ;;  %v581_v59 = vsel %vm507_vm0, %v569_v54, 0.0  ;;  %v572_v24 = vmul.f32 %v564_v34, %v461_v3 }
  0xd9   : > { %v584_v19 = vsel %vm507_vm0, %v570_v29, 0.0  ;;  %v587_v21 = vsel %vm507_vm0, %v571_v20, 0.0  ;;  %v573_v18 = vmul.f32 %v565_v30, %v462_v14  ;;  %v574_v27 = vmul.f32 %v566_v10, %v463_v46 }
  0xda   : > { %527 = vadd.xlane.f32.xlu0 %v526_v37  ;;  %530 = vadd.xlane.f32.xlu1 %v529_v45  ;;  %v590_v5 = vsel %vm507_vm0, %v572_v24, 0.0  ;;  %v1320_v17 = vand.u32 127, %v657_v16 }
  0xdb   : > { %v593_v57 = vsel %vm507_vm0, %v573_v18, 0.0  ;;  %v596_v43 = vsel %vm507_vm0, %v574_v27, 0.0  ;;  %v622_v61 = vpop.permute.xlu1 %621  ;;  %v624_v2 = vpop.permute.xlu0 %623 }
  0xdc   : > { %vm659_vm1 = vcmp.eq.s32.totalorder %v1320_v17, 0 }
  0xde   : > { %576 = vadd.xlane.f32.xlu0 %v575_v50  ;;  %579 = vadd.xlane.f32.xlu1 %v578_v0 }
  0xe2   : > { %582 = vadd.xlane.f32.xlu0 %v581_v59  ;;  %585 = vadd.xlane.f32.xlu1 %v584_v19 }
  0xe6   : > { %588 = vadd.xlane.f32.xlu0 %v587_v21  ;;  %591 = vadd.xlane.f32.xlu1 %v590_v5 }
  0xea   : > { %594 = vadd.xlane.f32.xlu0 %v593_v57  ;;  %597 = vadd.xlane.f32.xlu1 %v596_v43 }
  0xfb   : > { %625 = vrot.lane.b32.xlu1 %v1117_v44, %s970_s15  ;;  %v851_v44 = vld [vmem:[%s1401_s1 + $0xb] ss:$0 sm:$0xff] }
  0xfc   : > { %v637_v33 = vmul.f32 %v851_v44, %v614_v62  ;;  %v639_v49 = vmul.f32 %v851_v44, %v618_v63  ;;  %v640_v13 = vmul.f32 %v851_v44, %v620_v1  ;;  %v641_v55 = vmul.f32 %v851_v44, %v622_v61 }
  0xfd   : > { %v642_v15 = vmul.f32 %v851_v44, %v624_v2 }
  0xfe   : > { %v649_v46 = vadd.f32 %v852_v47, %v637_v33  ;;  %v651_v41 = vadd.f32 %v852_v47, %v639_v49  ;;  %v652_v48 = vadd.f32 %v852_v47, %v640_v13  ;;  %v653_v31 = vadd.f32 %v852_v47, %v641_v55 }
  0xff   : > { %v654_v52 = vadd.f32 %v852_v47, %v642_v15 }
 0x100   : > { %627 = vrot.lane.b32.xlu0 %v1111_v38, %s970_s15  ;;  %v638_v38 = vmul.f32 %v851_v44, %v616_v60 }
 0x102   : > { %v650_v14 = vadd.f32 %v852_v47, %v638_v38 }
 0x15b   : > { %v510_v3 = vpop.xlane.xlu1 %509  ;;  %v513_v4 = vpop.xlane.xlu0 %512 }
 0x15f   : > { %v519_v6 = vpop.xlane.xlu1 %518  ;;  %v516_v7 = vpop.xlane.xlu0 %515 }
 0x163   : > { %v525_v26 = vpop.xlane.xlu1 %524  ;;  %v522_v8 = vpop.xlane.xlu0 %521 }
 0x167   : > { %v1322_v9 = vpop.xlane.xlu1 %530  ;;  %v1324_v12 = vpop.xlane.xlu0 %527 }
 0x16b   : > { %v580_v23 = vpop.xlane.xlu1 %579  ;;  %v577_v22 = vpop.xlane.xlu0 %576 }
 0x16c   : > { %v661_v25 = vsel %vm659_vm1, %v513_v4, %v580_v23  ;;  %v660_v32 = vsel %vm659_vm1, %v510_v3, %v577_v22 }
 0x16d   : > { %v669_v35 = vadd.f32 %v661_v25, %v650_v14  ;;  %v668_v36 = vadd.f32 %v660_v32, %v649_v46 }
 0x16f   : > { %v678_v37 = vmul.f32 1.442695, %v669_v35  ;;  %v676_v45 = vmul.f32 1.442695, %v668_v36  ;;  %v586_v39 = vpop.xlane.xlu1 %585  ;;  %v583_v58 = vpop.xlane.xlu0 %582 }
 0x170   : > { %v663_v40 = vsel %vm659_vm1, %v519_v6, %v586_v39  ;;  %v662_v28 = vsel %vm659_vm1, %v516_v7, %v583_v58 }
 0x171   : > { %911 = vpow2.f32 %v678_v37  ;;  %v671_v11 = vadd.f32 %v663_v40, %v652_v48  ;;  %v670_v42 = vadd.f32 %v662_v28, %v651_v41 }
 0x172   : > { %913 = vpow2.f32 %v676_v45 }
 0x173   : > { %v682_v53 = vmul.f32 1.442695, %v671_v11  ;;  %v680_v34 = vmul.f32 1.442695, %v670_v42  ;;  %v592_v51 = vpop.xlane.xlu1 %591  ;;  %v589_v56 = vpop.xlane.xlu0 %588 }
 0x174   : > { %v665_v50 = vsel %vm659_vm1, %v525_v26, %v592_v51  ;;  %v664_v0 = vsel %vm659_vm1, %v522_v8, %v589_v56 }
 0x175   : > { %915 = vpow2.f32 %v682_v53  ;;  %v673_v54 = vadd.f32 %v665_v50, %v654_v52  ;;  %v672_v29 = vadd.f32 %v664_v0, %v653_v31 }
 0x176   : > { %917 = vpow2.f32 %v680_v34 }
 0x177   : > { %v686_v30 = vmul.f32 1.442695, %v673_v54  ;;  %v684_v10 = vmul.f32 1.442695, %v672_v29  ;;  %v598_v59 = vpop.xlane.xlu1 %597  ;;  %v595_v19 = vpop.xlane.xlu0 %594 }
 0x178   : > { %v667_v2 = vsel %vm659_vm1, %v1322_v9, %v598_v59  ;;  %v666_v3 = vsel %vm659_vm1, %v1324_v12, %v595_v19 }
 0x179   : > { %919 = vpow2.f32 %v686_v30 }
 0x17a   : > { %921 = vpow2.f32 %v684_v10 }
 0x17b   : > { %v912_v20 = vpop.eup %911  ;;  %v626_v24 = vpop.permute.xlu1 %625 }
 0x17c   : > { %v628_v21 = vpop.permute.xlu0 %627  ;;  %v914_v5 = vpop.eup %913  ;;  %v693_v18 = vmax.f32 %v912_v20, 1e-06  ;;  %v643_v27 = vmul.f32 %v851_v44, %v626_v24 }
 0x17d   : > { %v644_v57 = vmul.f32 %v851_v44, %v628_v21  ;;  %v692_v43 = vmax.f32 %v914_v5, 1e-06 }
 0x17e   : > { %v701_v60 = vsel %vm659_vm1, %v669_v35, %v693_v18  ;;  %v655_v62 = vadd.f32 %v852_v47, %v643_v27 }
 0x17f   : > { %v656_v63 = vadd.f32 %v852_v47, %v644_v57  ;;  %v916_v1 = vpop.eup %915  ;;  %710 = vst.msk [vmem:[%s1347_s6 + $0x8] sm:$0xff] %vm708_vm2, %v701_v60  ;;  %v700_v61 = vsel %vm659_vm1, %v668_v36, %v692_v43 }
 0x180   : > { %v918_v4 = vpop.eup %917  ;;  %709 = vst.msk [vmem:[%s1347_s6] sm:$0xff] %vm708_vm2, %v700_v61  ;;  %v695_v6 = vmax.f32 %v916_v1, 1e-06  ;;  %v674_v7 = vadd.f32 %v666_v3, %v655_v62 }
 0x181   : > { %v675_v16 = vadd.f32 %v667_v2, %v656_v63  ;;  %v694_v26 = vmax.f32 %v918_v4, 1e-06 }
 0x182   : > { %v703_v8 = vsel %vm659_vm1, %v671_v11, %v695_v6  ;;  %v688_v44 = vmul.f32 1.442695, %v674_v7 }
 0x183   : > { %v690_v38 = vmul.f32 1.442695, %v675_v16  ;;  %v920_v33 = vpop.eup %919  ;;  %712 = vst.msk [vmem:[%s1347_s6 + $0x18] sm:$0xff] %vm708_vm2, %v703_v8  ;;  %v702_v9 = vsel %vm659_vm1, %v670_v42, %v694_v26 }
 0x184   : > { %v922_v12 = vpop.eup %921  ;;  %711 = vst.msk [vmem:[%s1347_s6 + $0x10] sm:$0xff] %vm708_vm2, %v702_v9  ;;  %v697_v47 = vmax.f32 %v920_v33, 1e-06  ;;  %923 = vpow2.f32 %v688_v44 }
 0x185   : > { %v696_v49 = vmax.f32 %v922_v12, 1e-06  ;;  %925 = vpow2.f32 %v690_v38 }
 0x186   : > { %v705_v13 = vsel %vm659_vm1, %v673_v54, %v697_v47 }
 0x187   : > { %714 = vst.msk [vmem:[%s1347_s6 + $0x28] sm:$0xff] %vm708_vm2, %v705_v13  ;;  %v704_v14 = vsel %vm659_vm1, %v672_v29, %v696_v49 }
 0x188   : > { %713 = vst.msk [vmem:[%s1347_s6 + $0x20] sm:$0xff] %vm708_vm2, %v704_v14 }
 0x18e   : > { %v924_v46 = vpop.eup %923 }
 0x18f   : > { %v926_v23 = vpop.eup %925  ;;  %v698_v22 = vmax.f32 %v924_v46, 1e-06 }
 0x190   : > { %v699_v25 = vmax.f32 %v926_v23, 1e-06 }
 0x191   : > { %v706_v32 = vsel %vm659_vm1, %v674_v7, %v698_v22 }
 0x192   : > { %715 = vst.msk [vmem:[%s1347_s6 + $0x30] sm:$0xff] %vm708_vm2, %v706_v32  ;;  %v707_v35 = vsel %vm659_vm1, %v675_v16, %v699_v25 }
 0x193   : > { %716 = vst.msk [vmem:[%s1347_s6 + $0x38] sm:$0xff] %vm708_vm2, %v707_v35 }
 0x194 PF: > { %p13_p12 = scmp.ge.s32.totalorder %s1011_s17, 4   ;;  %s1406_s12 = smov %s953_s13 }
 0x195   : > { %s1407_s13 = smov %s957_s14  ;;  %s1408_s14 = smov %s1021_s20 }
 0x196   : > { %s1409_s15 = smov %s1011_s17  ;;  %15 = sbr.rel (!%p13_p12) target bundleno = 3 (0x3), region = 84 }
 0x19d   :  { %739 = vsyncpa [#allocation3], 1 }
 0x19e   :  { %741 = vsyncpa [#allocation3 + $0x1], 1 }

</bundles_post_ra>
